<compile_context>
chip_gen: v6e
topology: v6e:2x2x1
jax: 0.10.0
libtpu: 0.0.40
codegen_flags: <defaults>
</compile_context>

<pallas_src>
import jax
import jax.numpy as jnp
from jax.experimental import pallas as pl
from jax.experimental.pallas import tpu as pltpu


def _make_argmax_kernel(C: int, TC: int, nk: int, *, nan_aware: bool,
                        compute_dtype):
    """Build the kernel, closing over static class count C, class tile TC,
    number of class-tile steps nk, and the in-kernel compute dtype."""

    mask_edge = (C % TC) != 0          # only the last class tile has pad lanes
    last = nk - 1
    neg_inf = float("-inf")

    def kernel(x_ref, o_ref, max_sc, idx_sc):
        k = pl.program_id(1)

        @pl.when(k == 0)
        def _init():
            max_sc[...] = jnp.full_like(max_sc, neg_inf)
            idx_sc[...] = jnp.zeros_like(idx_sc)

        x = x_ref[...]
        if x.dtype != compute_dtype:
            # Only non-(f32|bf16) inputs pay a cast; bf16 stays bf16 (v6e/v7x
            # VALUs are bf16-native: 2x element throughput, half the vregs).
            x = x.astype(compute_dtype)
        if nan_aware:
            # torch treats NaN as the maximum.
            x = jnp.where(jnp.isnan(x), jnp.asarray(jnp.inf, compute_dtype), x)

        TB = x.shape[0]
        # Local lane index 0..TC-1 (no + k*TC on the full tile).
        col = jax.lax.broadcasted_iota(jnp.int32, (TB, TC), 1)

        def combine(xv):
            tile_max = jnp.max(xv, axis=1, keepdims=True)               # (TB,1)
            # First (lowest) index of the tile max — torch tie-break.
            tile_idx = jnp.min(jnp.where(xv == tile_max, col, jnp.int32(TC)),
                               axis=1, keepdims=True) + k * TC          # (TB,1)
            tile_max32 = tile_max.astype(jnp.float32)
            # Strict '>' keeps first-index tie-break across class tiles.
            take_new = tile_max32 > max_sc[...]
            max_sc[...] = jnp.where(take_new, tile_max32, max_sc[...])
            idx_sc[...] = jnp.where(take_new, tile_idx, idx_sc[...])

        if mask_edge:
            # Interior tiles: no masking at all.
            @pl.when(k < last)
            def _interior():
                combine(x)

            # Edge tile: mask padding lanes to -inf before the reduce.
            @pl.when(k == last)
            def _edge():
                valid = col < (C - last * TC)
                combine(jnp.where(valid, x,
                                  jnp.asarray(neg_inf, compute_dtype)))
        else:
            combine(x)

        @pl.when(k == last)
        def _finalize():
            o_ref[...] = idx_sc[...]

    return kernel


def output_layer(summation: jax.Array, *, tb=None, tc=None,
                 nan_aware: bool = True) -> jax.Array:
    """Pallas equivalent of OutputLayer.forward: argmax over dim=1 -> (B,) int32."""
    B, C = summation.shape
    dtype = summation.dtype

    # Compute dtype: keep f32/bf16 native, cast anything else to f32.
    if dtype in (jnp.float32, jnp.bfloat16):
        compute_dtype = dtype
    else:
        compute_dtype = jnp.float32

    # Tile defaults: big class tile (fewer reduction steps / accumulator
    # passes), sized so 2x double-buffered input tiles + output + scratch stay
    # inside scoped VMEM on every generation (v5e 16 MiB default .. v7x 64 MiB
    # physical).  tb=512 x tc=2048 f32 = 4 MiB/tile, 8 MiB double-buffered.
    if tb is None:
        tb = B if B <= 512 else 512
    if tc is None:
        tc = C if C <= 2048 else 2048

    # (sublane, lane) minimum-tile guards: block dims must be divisible by the
    # dtype's min tile or equal the full array dim.
    min_sub = 8 if dtype.itemsize >= 4 else (16 if dtype.itemsize == 2 else 32)
    if tb != B and tb % min_sub != 0:
        tb = min(B, pl.cdiv(tb, min_sub) * min_sub)
    if tc != C and tc % 128 != 0:
        tc = min(C, pl.cdiv(tc, 128) * 128)

    nk = pl.cdiv(C, tc)
    grid = (pl.cdiv(B, tb), nk)        # reduction (class) axis last

    out = pl.pallas_call(
        _make_argmax_kernel(C, tc, nk, nan_aware=nan_aware,
                            compute_dtype=compute_dtype),
        out_shape=jax.ShapeDtypeStruct((B, 1), jnp.int32),
        grid_spec=pltpu.PrefetchScalarGridSpec(
            num_scalar_prefetch=0,
            grid=grid,
            in_specs=[pl.BlockSpec((tb, tc), lambda i, k: (i, k))],
            # Same output block across the class axis -> per-row result slot,
            # written once on the final k step.
            out_specs=pl.BlockSpec((tb, 1), lambda i, k: (i, 0)),
            scratch_shapes=[pltpu.VMEM((tb, 1), jnp.float32),
                            pltpu.VMEM((tb, 1), jnp.int32)],
        ),
        compiler_params=pltpu.CompilerParams(
            # TODO(synk): on v7x consider pltpu.CORE_PARALLEL on the row axis
            # (or pl.core_map) to guarantee both TensorCores split the rows.
            dimension_semantics=("parallel", "arbitrary"),
            vmem_limit_bytes=32 * 1024 * 1024,
        ),
        cost_estimate=pl.CostEstimate(
            flops=6 * B * C,
            transcendentals=0,
            bytes_accessed=B * C * dtype.itemsize + B * 4,
        ),
    )(summation)

    # NOTE: for tiny B*C, plain jnp.argmax beats the pallas_call launch
    # overhead; callers can branch on size if that matters.
    return out[:, 0]


if __name__ == "__main__":
    key = jax.random.PRNGKey(0)
    k0, k1, k2 = jax.random.split(key, 3)

    # 1) Small aligned case (single block, full-dim tiles), f32.
    B, C = 8, 32
    summation = jax.random.normal(k0, (B, C), dtype=jnp.float32)
    result = output_layer(summation)
    jax.block_until_ready(result)
    expected = jnp.argmax(summation, axis=1).astype(jnp.int32)
    assert result.shape == (B,), result.shape
    assert bool(jnp.all(result == expected)), (result, expected)

    # Same input with the finite-input fast path (no NaN handling ops).
    r1b = output_layer(summation, nan_aware=False)
    jax.block_until_ready(r1b)
    assert bool(jnp.all(r1b == expected)), (r1b, expected)

    # 2) Non-aligned case exercising the gridded reduction path
    #    (partial row & class edge tiles, edge-only masking, cross-tile
    #    tie-break), f32.
    B2, C2 = 20, 300
    x2 = jax.random.normal(k1, (B2, C2), dtype=jnp.float32)
    r2 = output_layer(x2, tb=8, tc=128)
    jax.block_until_ready(r2)
    e2 = jnp.argmax(x2, axis=1).astype(jnp.int32)
    assert r2.shape == (B2,), r2.shape
    assert bool(jnp.all(r2 == e2)), (r2, e2)

    # 3) bf16 fast path: native-dtype reduction, multiple interior class tiles
    #    (no edge mask since 384 % 128 == 0), bf16-legal (16, 128) block.
    B3, C3 = 16, 384
    x3 = jax.random.normal(k2, (B3, C3), dtype=jnp.float32).astype(jnp.bfloat16)
    r3 = output_layer(x3, tb=16, tc=128)
    jax.block_until_ready(r3)
    e3 = jnp.argmax(x3, axis=1).astype(jnp.int32)
    assert bool(jnp.all(r3 == e3)), (r3, e3)

    print("KERNEL_OK")
</pallas_src>

<mosaic_0001>
module attributes {stable_mosaic.version = 11 : i64} {
  func.func @kernel(%arg0: i32, %arg1: i32, %arg2: memref<8x32xf32, #tpu.memory_space<vmem>>, %arg3: memref<8x1xi32, #tpu.memory_space<vmem>>, %arg4: memref<8x1xf32, #tpu.memory_space<vmem>>, %arg5: memref<8x1xi32, #tpu.memory_space<vmem>>) attributes {dimension_semantics = [#tpu.dimension_semantics<parallel>, #tpu.dimension_semantics<arbitrary>], iteration_bounds = array<i64: 1, 1>, scalar_prefetch = 0 : i64, scratch_operands = 2 : i64, tpu.core_type = #tpu.core_type<tc>, window_params = [{transform_indices = @transform_0, window_bounds = array<i64: 8, 32>}, {transform_indices = @transform_1, window_bounds = array<i64: 8, 1>}]} {
    %c0_i32 = arith.constant 0 : i32
    %0 = arith.cmpi eq, %arg1, %c0_i32 : i32
    %1 = arith.extui %0 : i1 to i32
    %c0_i32_0 = arith.constant 0 : i32
    %2 = arith.cmpi ne, %1, %c0_i32_0 : i32
    scf.if %2 {
      %cst_17 = arith.constant 0xFF800000 : f32
      %30 = vector.broadcast %cst_17 : f32 to vector<8x1xf32>
      %c0_18 = arith.constant 0 : index
      %c0_19 = arith.constant 0 : index
      %31 = vector.load %arg4[%c0_18, %c0_19] : memref<8x1xf32, #tpu.memory_space<vmem>>, vector<8x1xf32>
      tpu.vector_store %arg4[%c0_18, %c0_19], %30 {strides = array<i32>} : memref<8x1xf32, #tpu.memory_space<vmem>>, vector<8x1xf32>,
      %c0_i32_20 = arith.constant 0 : i32
      %32 = vector.broadcast %c0_i32_20 : i32 to vector<8x1xi32>
      %c0_21 = arith.constant 0 : index
      %c0_22 = arith.constant 0 : index
      %33 = vector.load %arg5[%c0_21, %c0_22] : memref<8x1xi32, #tpu.memory_space<vmem>>, vector<8x1xi32>
      tpu.vector_store %arg5[%c0_21, %c0_22], %32 {strides = array<i32>} : memref<8x1xi32, #tpu.memory_space<vmem>>, vector<8x1xi32>,
    } else {
    }
    %c0 = arith.constant 0 : index
    %c0_1 = arith.constant 0 : index
    %3 = vector.load %arg2[%c0, %c0_1] : memref<8x32xf32, #tpu.memory_space<vmem>>, vector<8x32xf32>
    %4 = arith.cmpf one, %3, %3 : vector<8x32xf32>
    %cst = arith.constant 0x7F800000 : f32
    %5 = vector.broadcast %cst : f32 to vector<8x32xf32>
    %6 = arith.select %4, %5, %3 : vector<8x32xi1>, vector<8x32xf32>
    %7 = tpu.iota {dimensions = array<i32: 1>} : vector<8x32xi32>
    %cst_2 = arith.constant dense<0xFF800000> : vector<8xf32>
    %8 = vector.multi_reduction <maximumf>, %6, %cst_2 [1] : vector<8x32xf32> to vector<8xf32>
    %9 = vector.shape_cast %8 : vector<8xf32> to vector<8x1xf32>
    %10 = vector.broadcast %9 : vector<8x1xf32> to vector<8x32xf32>
    %11 = arith.cmpf oeq, %6, %10 : vector<8x32xf32>
    %c32_i32 = arith.constant 32 : i32
    %12 = vector.broadcast %c32_i32 : i32 to vector<8x32xi32>
    %13 = arith.select %11, %7, %12 : vector<8x32xi1>, vector<8x32xi32>
    %cst_3 = arith.constant dense<2147483647> : vector<8xi32>
    %14 = vector.multi_reduction <minsi>, %13, %cst_3 [1] : vector<8x32xi32> to vector<8xi32>
    %15 = vector.shape_cast %14 : vector<8xi32> to vector<8x1xi32>
    %c32_i32_4 = arith.constant 32 : i32
    %16 = arith.muli %arg1, %c32_i32_4 : i32
    %17 = vector.broadcast %16 : i32 to vector<8x1xi32>
    %18 = arith.addi %15, %17 : vector<8x1xi32>
    %c0_5 = arith.constant 0 : index
    %c0_6 = arith.constant 0 : index
    %19 = vector.load %arg4[%c0_5, %c0_6] : memref<8x1xf32, #tpu.memory_space<vmem>>, vector<8x1xf32>
    %20 = arith.cmpf ogt, %9, %19 : vector<8x1xf32>
    %c0_7 = arith.constant 0 : index
    %c0_8 = arith.constant 0 : index
    %21 = vector.load %arg4[%c0_7, %c0_8] : memref<8x1xf32, #tpu.memory_space<vmem>>, vector<8x1xf32>
    %22 = arith.select %20, %9, %21 : vector<8x1xi1>, vector<8x1xf32>
    %c0_9 = arith.constant 0 : index
    %c0_10 = arith.constant 0 : index
    %23 = vector.load %arg4[%c0_9, %c0_10] : memref<8x1xf32, #tpu.memory_space<vmem>>, vector<8x1xf32>
    tpu.vector_store %arg4[%c0_9, %c0_10], %22 {strides = array<i32>} : memref<8x1xf32, #tpu.memory_space<vmem>>, vector<8x1xf32>,
    %c0_11 = arith.constant 0 : index
    %c0_12 = arith.constant 0 : index
    %24 = vector.load %arg5[%c0_11, %c0_12] : memref<8x1xi32, #tpu.memory_space<vmem>>, vector<8x1xi32>
    %25 = arith.select %20, %18, %24 : vector<8x1xi1>, vector<8x1xi32>
    %c0_13 = arith.constant 0 : index
    %c0_14 = arith.constant 0 : index
    %26 = vector.load %arg5[%c0_13, %c0_14] : memref<8x1xi32, #tpu.memory_space<vmem>>, vector<8x1xi32>
    tpu.vector_store %arg5[%c0_13, %c0_14], %25 {strides = array<i32>} : memref<8x1xi32, #tpu.memory_space<vmem>>, vector<8x1xi32>,
    %c0_i32_15 = arith.constant 0 : i32
    %27 = arith.cmpi eq, %arg1, %c0_i32_15 : i32
    %28 = arith.extui %27 : i1 to i32
    %c0_i32_16 = arith.constant 0 : i32
    %29 = arith.cmpi ne, %28, %c0_i32_16 : i32
    scf.if %29 {
      %c0_17 = arith.constant 0 : index
      %c0_18 = arith.constant 0 : index
      %30 = vector.load %arg5[%c0_17, %c0_18] : memref<8x1xi32, #tpu.memory_space<vmem>>, vector<8x1xi32>
      %c0_19 = arith.constant 0 : index
      %c0_20 = arith.constant 0 : index
      %31 = vector.load %arg3[%c0_19, %c0_20] : memref<8x1xi32, #tpu.memory_space<vmem>>, vector<8x1xi32>
      tpu.vector_store %arg3[%c0_19, %c0_20], %30 {strides = array<i32>} : memref<8x1xi32, #tpu.memory_space<vmem>>, vector<8x1xi32>,
    } else {
    }
    return
  }
  func.func @transform_0(%arg0: i32, %arg1: i32) -> (i32, i32) {
    %c0_i32 = arith.constant 0 : i32
    return %arg0, %arg1 : i32, i32
  }
  func.func @transform_1(%arg0: i32, %arg1: i32) -> (i32, i32) {
    %c0_i32 = arith.constant 0 : i32
    %c0_i32_0 = arith.constant 0 : i32
    return %arg0, %c0_i32 : i32, i32
  }
}

</mosaic_0001>

<bundles_post_ra>
// kernel: tpu_custom_call.1
= control target key start
LH: loop header
LB: loop body
LE: loop exit
PB: predicated region body
PF: predicated region fallthrough
CT: control target
= control target key end

     0   :  { %6 = vsyncpa [#allocation5], 0  ;;  %s99_s6 = smov [#allocation4]   ;;  %s125_s0 = inlined_call_operand.hbm [shape: f32[8,32], index: 0, kind: input, shape index: {}]   ;;  %s126_s1 = inlined_call_operand.vmem [shape: s32[8,1], index: 1, kind: output, shape index: {}]  }
   0x1   :  { %s13_s7 = sshll.u32 %s99_s6, 4  ;;  %s14_s7 = int_to_ptr.vmem [resolvable:$true] %s13_s7 }
   0x2   :  { %s85_s8 = scalar_lea.vmem %s14_s7, 128  ;;  %p90_p1 = scmp.lt.s32.totalorder %s14_s7, %s14_s7 }
   0x3   :  { %p86_p0 = scmp.ne.s32.totalorder %s14_s7, %s85_s8  ;;  %p91_p2 = scmp.lt.s32.totalorder %s85_s8, %s85_s8 }
   0x5   :  { %p92_p3 = por %p91_p2, %p90_p1 }
   0x7   :  { %p93_p4 = pnand %p92_p3, %p86_p0 }
   0x9   :  { %96 = shalt.err (!%p93_p4)
}
   0xa   :  { %16 = dma.hbm_to_vmem [thread:$0]  %s125_s0, 128, %s14_s7, [#allocation5]  }
   0xb   :  { %97 = dma.done.wait [#allocation5], 128  }
   0xc   :  { %98 = vsyncadd [#allocation5], 4294967168  ;;  %vm24_vm0 = vcmask 7168   ;;  %v100_v0 = vmov -inf   ;;  %v27_v1 = vld [vmem:[#allocation4] sm:$0xff]  ;;  %vm32_vm1 = vcmask 261120   ;;  %v30_v4 = vlaneseq }
   0xd   :  { %25 = vst.msk [vmem:[#allocation2] sm:$0xff] %vm24_vm0, %v100_v0  ;;  %vm28_vm2 = vcmp.ne.f32.partialorder %v27_v1, %v27_v1  ;;  %v101_v13 = vmov 0  }
   0xe   :  { %v29_v2 = vsel %vm28_vm2, inf, %v27_v1  ;;  %v31_v6 = vand.u32 127, %v30_v4  ;;  %26 = vst.msk [vmem:[#allocation3] sm:$0xff] %vm24_vm0, %v101_v13 }
   0xf   :  { %v33_v3 = vsel %vm32_vm1, %v29_v2, -inf }
  0x10   :  { %34 = vmax.xlane.f32.xlu0 %v33_v3 }
  0x14   :  { %v56_v5 = vld [vmem:[#allocation2] sm:$0xff] }
  0x15   :  { %v61_v22 = vld [vmem:[#allocation3] sm:$0xff] }
  0x99   :  { %v35_v7 = vpop.xlane.xlu0 %34 }
  0x9a   :  { %vm36_vm3 = vcmp.eq.f32.partialorder %v29_v2, %v35_v7  ;;  %vm57_vm4 = vcmp.gt.f32.partialorder %v35_v7, %v56_v5 }
  0x9b   :  { %v58_v8 = vsel %vm57_vm4, %v35_v7, %v56_v5  ;;  %v37_v9 = vsel %vm36_vm3, %v31_v6, 32 }
  0x9c   :  { %60 = vst.msk [vmem:[#allocation2] sm:$0xff] %vm24_vm0, %v58_v8  ;;  %v38_v10 = vsel %vm32_vm1, %v37_v9, 2147483647 }
  0x9d   :  { %v40_v11 = vshra.s32 %v38_v10, 16  ;;  %v39_v14 = vand.u32 65535, %v38_v10 }
  0x9f   :  { %v42_v12 = vcvt.s32.f32 %v40_v11  ;;  %v41_v16 = vcvt.s32.f32 %v39_v14 }
  0xa1   :  { %43 = vmin.xlane.f32.xlu0 %v42_v12 }
 0x12a   :  { %v44_v15 = vpop.xlane.xlu0 %43 }
 0x12b   :  { %vm45_vm5 = vcmp.eq.f32.partialorder %v42_v12, %v44_v15  ;;  %v50_v18 = vcvt.f32.s32 %v44_v15 }
 0x12c   :  { %v46_v17 = vsel %vm45_vm5, %v41_v16, inf }
 0x12d   :  { %47 = vmin.xlane.f32.xlu1 %v46_v17  ;;  %v51_v20 = vshll.u32 %v50_v18, 16 }
 0x1b6   :  { %v48_v19 = vpop.xlane.xlu1 %47 }
 0x1b7   :  { %v49_v21 = vcvt.f32.s32 %v48_v19 }
 0x1b9   :  { %v52_v23 = vadd.s32 %v51_v20, %v49_v21 }
 0x1bb   :  { %v62_v24 = vsel %vm57_vm4, %v52_v23, %v61_v22 }
 0x1bc   :  { %63 = vst.msk [vmem:[#allocation3] sm:$0xff] %vm24_vm0, %v62_v24 }
 0x1c3   :  { %v67_v25 = vld [vmem:[#allocation3] sm:$0xff] }
 0x1c4   :  { %68 = vst.msk [vmem:[%s126_s1] sm:$0xff] %vm24_vm0, %v67_v25 }
 0x1c5   :  { %73 = vsyncpa [#allocation5], 1 }

</bundles_post_ra>
